<compile_context>
chip_gen: v6e
topology: v6e:2x2x1
jax: 0.10.0
libtpu: 0.0.40
codegen_flags: <defaults>
</compile_context>

<pallas_src>
import functools

import jax
import jax.numpy as jnp
from jax.experimental import pallas as pl
from jax.experimental.pallas import tpu as pltpu

EPS = 1e-5
HIDDEN = 256
OUT_HIDDEN = 64
OUT_PAD = 128  # lane-dense padded width for the penultimate layer (64 -> 128)


def _round_up(n, m):
    return (n + m - 1) // m * m


# ---------------------------------------------------------------------------
# Kernel
# ---------------------------------------------------------------------------
def mlp_kernel(x_ref, w1_ref, w2_ref, w3_ref, w4_ref,
               vec256_ref, vec128_ref, out_ref, *, fold_scale):
    x = x_ref[...]
    v256 = vec256_ref[...]          # (6,256) folded: b1',t1,b2',t2,b3',t3
    v128 = vec128_ref[...]          # (3,128): b4_pad, w5col_pad, b5(pad)
    wdt = w1_ref.dtype              # matmul operand dtype (f32 or bf16)

    if fold_scale:
        b1, t1 = v256[0:1], v256[1:2]
        b2, t2 = v256[2:3], v256[3:4]
        b3, t3 = v256[4:5], v256[5:6]
        s1 = s2 = s3 = None
    else:                           # exact fallback: (9,256) b,s,t per layer
        b1, s1, t1 = v256[0:1], v256[1:2], v256[2:3]
        b2, s2, t2 = v256[3:4], v256[4:5], v256[5:6]
        b3, s3, t3 = v256[6:7], v256[7:8], v256[8:9]

    b4 = v128[0:1]                  # (1,128)
    w5col = v128[1:2]               # (1,128), cols >= 64 are zero
    b5 = v128[2:3, 0:1]             # (1,1)

    def block(h, w_ref, b, s, t):
        # Linear -> ReLU -> folded BN -> Dropout(identity)
        z = jnp.dot(h.astype(wdt), w_ref[...],
                    preferred_element_type=jnp.float32) + b
        z = jnp.maximum(z, 0.0)
        if s is not None:           # static branch (trace-time)
            z = z * s
        return z + t

    h = block(x, w1_ref, b1, s1, t1)            # input block
    h = block(h, w2_ref, b2, s2, t2) + h        # res1 + residual
    h = block(h, w3_ref, b3, s3, t3) + h        # res2 + residual

    # out block: Linear(256->64, padded to 128 lanes) -> ReLU -> Linear(64->1)
    # The 64->1 layer is a VPU multiply by the single w5 column + lane-sum (XLU),
    # so only a (TB, 1) column is ever written to HBM.
    o = jnp.dot(h.astype(wdt), w4_ref[...],
                preferred_element_type=jnp.float32) + b4
    o = jnp.maximum(o, 0.0)
    out = jnp.sum(o * w5col, axis=-1, keepdims=True) + b5
    out_ref[...] = out.astype(out_ref.dtype)


# ---------------------------------------------------------------------------
# Parameter construction (PyTorch-style raw params) and host-side preparation
# ---------------------------------------------------------------------------
def init_params(key, input_dim):
    ks = jax.random.split(key, 22)

    def lin(kw, kb, fan_in, fan_out):
        scale = 1.0 / jnp.sqrt(jnp.float32(fan_in))
        w = jax.random.uniform(kw, (fan_in, fan_out), jnp.float32, -scale, scale)
        b = jax.random.uniform(kb, (1, fan_out), jnp.float32, -scale, scale)
        return w, b

    def bn(kg, kb, km, kv, dim):
        gamma = 1.0 + 0.1 * jax.random.normal(kg, (1, dim), jnp.float32)
        beta = 0.1 * jax.random.normal(kb, (1, dim), jnp.float32)
        mean = 0.1 * jax.random.normal(km, (1, dim), jnp.float32)
        var = 1.0 + 0.1 * jax.random.uniform(kv, (1, dim), jnp.float32)
        return gamma, beta, mean, var

    p = {}
    p["w1"], p["b1"] = lin(ks[0], ks[1], input_dim, HIDDEN)
    p["g1"], p["be1"], p["m1"], p["v1"] = bn(ks[2], ks[3], ks[4], ks[5], HIDDEN)
    p["w2"], p["b2"] = lin(ks[6], ks[7], HIDDEN, HIDDEN)
    p["g2"], p["be2"], p["m2"], p["v2"] = bn(ks[8], ks[9], ks[10], ks[11], HIDDEN)
    p["w3"], p["b3"] = lin(ks[12], ks[13], HIDDEN, HIDDEN)
    p["g3"], p["be3"], p["m3"], p["v3"] = bn(ks[14], ks[15], ks[16], ks[17], HIDDEN)
    p["w4"], p["b4"] = lin(ks[18], ks[19], HIDDEN, OUT_HIDDEN)
    p["w5"], p["b5"] = lin(ks[20], ks[21], OUT_HIDDEN, 1)
    return p


def prepare_params(p, compute_dtype=jnp.float32):
    """Fold eval-mode BN, pre-scale weights when valid, pad/pack small vectors.

    Must be called with concrete (non-traced) params: the fold-validity check
    (all BN scales > 0) is decided on the host and selects a static kernel path.
    """
    def fold(g, be, m, v):
        s = g * jax.lax.rsqrt(v + EPS)
        return s, be - m * s

    s1, t1 = fold(p["g1"], p["be1"], p["m1"], p["v1"])
    s2, t2 = fold(p["g2"], p["be2"], p["m2"], p["v2"])
    s3, t3 = fold(p["g3"], p["be3"], p["m3"], p["v3"])

    # s * relu(z) == relu(s * z) only when s > 0 elementwise.
    fold_scale = bool(jnp.all(s1 > 0) & jnp.all(s2 > 0) & jnp.all(s3 > 0))

    if fold_scale:
        w1, b1 = p["w1"] * s1, p["b1"] * s1
        w2, b2 = p["w2"] * s2, p["b2"] * s2
        w3, b3 = p["w3"] * s3, p["b3"] * s3
        vec256 = jnp.concatenate([b1, t1, b2, t2, b3, t3], axis=0)          # (6, 256)
    else:
        w1, w2, w3 = p["w1"], p["w2"], p["w3"]
        vec256 = jnp.concatenate(
            [p["b1"], s1, t1, p["b2"], s2, t2, p["b3"], s3, t3], axis=0)     # (9, 256)

    # Zero-padding is exact: padded columns stay 0 through ReLU and the padded
    # w5 column entries are 0, so they contribute nothing to the lane-sum.
    w4 = jnp.pad(p["w4"], ((0, 0), (0, OUT_PAD - OUT_HIDDEN)))               # (256, 128)
    b4 = jnp.pad(p["b4"], ((0, 0), (0, OUT_PAD - OUT_HIDDEN)))               # (1, 128)
    w5col = jnp.pad(p["w5"].T, ((0, 0), (0, OUT_PAD - OUT_HIDDEN)))          # (1, 128)
    b5row = jnp.pad(p["b5"], ((0, 0), (0, OUT_PAD - 1)))                     # (1, 128)
    vec128 = jnp.concatenate([b4, w5col, b5row], axis=0)                     # (3, 128)

    weights = tuple(w.astype(compute_dtype) for w in (w1, w2, w3, w4))
    return weights + (vec256.astype(jnp.float32), vec128.astype(jnp.float32))


# ---------------------------------------------------------------------------
# Wrapper
# ---------------------------------------------------------------------------
@functools.partial(jax.jit, static_argnames=("tb",))
def deep_residual_mlp(x, kparams, *, tb=1024):
    w1, w2, w3, w4, vec256, vec128 = kparams
    B, D = x.shape
    fold_scale = (vec256.shape[0] == 6)   # static: packing decides the kernel path

    # Batch tile: multiple of 8 sublanes; default 1024 to amortize per-grid-step
    # overhead; capped at 2048 so activation tiles stay well inside v7x's 64 MiB VMEM.
    TB = min(tb, _round_up(B, 8), 2048)
    # v7x megacore: prefer >=2 grid steps when each half-tile is still large
    # enough (>=512 rows) to amortize the per-step overhead.
    if pl.cdiv(B, TB) < 2:
        half = _round_up((_round_up(B, 8) + 1) // 2, 8)
        if half >= 512:
            TB = min(TB, half)
    grid = (pl.cdiv(B, TB),)   # ragged last tile handled by Pallas masking (no x pad)

    def resident(shape):
        # Block index is constant across the grid -> stays VMEM-resident (no re-DMA).
        return pl.BlockSpec(shape, lambda i: (0, 0))

    kernel = functools.partial(mlp_kernel, fold_scale=fold_scale)

    out = pl.pallas_call(
        kernel,
        out_shape=jax.ShapeDtypeStruct((B, 1), jnp.float32),
        grid=grid,
        in_specs=[
            pl.BlockSpec((TB, D), lambda i: (i, 0)),        # x: tiled over batch
            resident(w1.shape), resident(w2.shape), resident(w3.shape),
            resident(w4.shape),
            resident(vec256.shape), resident(vec128.shape),
        ],
        out_specs=pl.BlockSpec((TB, 1), lambda i: (i, 0)),   # single useful column only
        compiler_params=pltpu.CompilerParams(
            dimension_semantics=("parallel",)),               # megacore sharding on v7x
    )(x, w1, w2, w3, w4, vec256, vec128)

    return out


# ---------------------------------------------------------------------------
# Pure-JAX reference (unfolded BN, f32) — matches eval-mode PyTorch
# ---------------------------------------------------------------------------
def reference(x, p):
    def bn(h, g, be, m, v):
        return (h - m) * jax.lax.rsqrt(v + EPS) * g + be

    h = jnp.maximum(x @ p["w1"] + p["b1"], 0.0)
    h = bn(h, p["g1"], p["be1"], p["m1"], p["v1"])
    r = jnp.maximum(h @ p["w2"] + p["b2"], 0.0)
    r = bn(r, p["g2"], p["be2"], p["m2"], p["v2"])
    h = r + h
    r = jnp.maximum(h @ p["w3"] + p["b3"], 0.0)
    r = bn(r, p["g3"], p["be3"], p["m3"], p["v3"])
    h = r + h
    o = jnp.maximum(h @ p["w4"] + p["b4"], 0.0)
    return o @ p["w5"] + p["b5"]


if __name__ == "__main__":
    key = jax.random.PRNGKey(0)
    k_x, k_p, k_x2 = jax.random.split(key, 3)

    batch, input_dim = 8, 32
    x = jax.random.normal(k_x, (batch, input_dim), jnp.float32)
    params = init_params(k_p, input_dim)

    # f32 folded path: must match the eval-mode reference tightly.
    kp_f32 = prepare_params(params, jnp.float32)
    out = jax.block_until_ready(deep_residual_mlp(x, kp_f32))
    ref = reference(x, params)
    assert out.shape == (batch, 1), out.shape
    assert jnp.allclose(out, ref, atol=1e-4, rtol=1e-4), \
        float(jnp.max(jnp.abs(out - ref)))

    # Multi-tile grid + ragged (masked) last tile: B=40, tb=16 -> grid of 3.
    x2 = jax.random.normal(k_x2, (40, input_dim), jnp.float32)
    out2 = jax.block_until_ready(deep_residual_mlp(x2, kp_f32, tb=16))
    ref2 = reference(x2, params)
    assert out2.shape == (40, 1), out2.shape
    assert jnp.allclose(out2, ref2, atol=1e-4, rtol=1e-4), \
        float(jnp.max(jnp.abs(out2 - ref2)))

    # Non-folded fallback path (a non-positive gamma disables the weight fold).
    params_neg = dict(params)
    params_neg["g2"] = params["g2"].at[0, 0].set(-0.5)
    kp_neg = prepare_params(params_neg, jnp.float32)
    assert kp_neg[4].shape[0] == 9, kp_neg[4].shape   # unfolded (b, s, t) packing
    out3 = jax.block_until_ready(deep_residual_mlp(x, kp_neg))
    ref3 = reference(x, params_neg)
    assert jnp.allclose(out3, ref3, atol=1e-4, rtol=1e-4), \
        float(jnp.max(jnp.abs(out3 - ref3)))

    # bf16-weight path (v6e/v7x MXU fast path): loose sanity check vs f32 reference.
    kp_bf16 = prepare_params(params, jnp.bfloat16)
    out4 = jax.block_until_ready(deep_residual_mlp(x, kp_bf16))
    assert out4.shape == (batch, 1), out4.shape
    assert bool(jnp.all(jnp.isfinite(out4)))
    assert float(jnp.max(jnp.abs(out4 - ref))) < 0.1 * (float(jnp.max(jnp.abs(ref))) + 1.0)

    print("KERNEL_OK")
</pallas_src>

<mosaic_0001>
module attributes {stable_mosaic.version = 11 : i64} {
  func.func @mlp_kernel(%arg0: i32, %arg1: memref<8x32xf32, #tpu.memory_space<vmem>>, %arg2: memref<32x256xf32, #tpu.memory_space<vmem>>, %arg3: memref<256x256xf32, #tpu.memory_space<vmem>>, %arg4: memref<256x256xf32, #tpu.memory_space<vmem>>, %arg5: memref<256x128xf32, #tpu.memory_space<vmem>>, %arg6: memref<6x256xf32, #tpu.memory_space<vmem>>, %arg7: memref<3x128xf32, #tpu.memory_space<vmem>>, %arg8: memref<8x1xf32, #tpu.memory_space<vmem>>) attributes {dimension_semantics = [#tpu.dimension_semantics<parallel>], iteration_bounds = array<i64: 1>, scalar_prefetch = 0 : i64, scratch_operands = 0 : i64, tpu.core_type = #tpu.core_type<tc>, window_params = [{transform_indices = @transform_0, window_bounds = array<i64: 8, 32>}, {pipeline_mode = #tpu.pipeline_mode<synchronous>, transform_indices = @transform_1, window_bounds = array<i64: 32, 256>}, {pipeline_mode = #tpu.pipeline_mode<synchronous>, transform_indices = @transform_2, window_bounds = array<i64: 256, 256>}, {pipeline_mode = #tpu.pipeline_mode<synchronous>, transform_indices = @transform_3, window_bounds = array<i64: 256, 256>}, {pipeline_mode = #tpu.pipeline_mode<synchronous>, transform_indices = @transform_4, window_bounds = array<i64: 256, 128>}, {pipeline_mode = #tpu.pipeline_mode<synchronous>, transform_indices = @transform_5, window_bounds = array<i64: 6, 256>}, {pipeline_mode = #tpu.pipeline_mode<synchronous>, transform_indices = @transform_6, window_bounds = array<i64: 3, 128>}, {transform_indices = @transform_7, window_bounds = array<i64: 8, 1>}]} {
    %c0 = arith.constant 0 : index
    %c0_0 = arith.constant 0 : index
    %0 = vector.load %arg1[%c0, %c0_0] : memref<8x32xf32, #tpu.memory_space<vmem>>, vector<8x32xf32>
    %c0_1 = arith.constant 0 : index
    %c0_2 = arith.constant 0 : index
    %1 = vector.load %arg6[%c0_1, %c0_2] : memref<6x256xf32, #tpu.memory_space<vmem>>, vector<6x256xf32>
    %c0_3 = arith.constant 0 : index
    %c0_4 = arith.constant 0 : index
    %2 = vector.load %arg7[%c0_3, %c0_4] : memref<3x128xf32, #tpu.memory_space<vmem>>, vector<3x128xf32>
    %3 = vector.extract_strided_slice %1 {offsets = [0, 0], sizes = [1, 256], strides = [1, 1]} : vector<6x256xf32> to vector<1x256xf32>
    %4 = vector.extract_strided_slice %1 {offsets = [1, 0], sizes = [1, 256], strides = [1, 1]} : vector<6x256xf32> to vector<1x256xf32>
    %5 = vector.extract_strided_slice %1 {offsets = [2, 0], sizes = [1, 256], strides = [1, 1]} : vector<6x256xf32> to vector<1x256xf32>
    %6 = vector.extract_strided_slice %1 {offsets = [3, 0], sizes = [1, 256], strides = [1, 1]} : vector<6x256xf32> to vector<1x256xf32>
    %7 = vector.extract_strided_slice %1 {offsets = [4, 0], sizes = [1, 256], strides = [1, 1]} : vector<6x256xf32> to vector<1x256xf32>
    %8 = vector.extract_strided_slice %1 {offsets = [5, 0], sizes = [1, 256], strides = [1, 1]} : vector<6x256xf32> to vector<1x256xf32>
    %9 = vector.extract_strided_slice %2 {offsets = [0, 0], sizes = [1, 128], strides = [1, 1]} : vector<3x128xf32> to vector<1x128xf32>
    %10 = vector.extract_strided_slice %2 {offsets = [1, 0], sizes = [1, 128], strides = [1, 1]} : vector<3x128xf32> to vector<1x128xf32>
    %11 = vector.extract_strided_slice %2 {offsets = [2, 0], sizes = [1, 1], strides = [1, 1]} : vector<3x128xf32> to vector<1x1xf32>
    %c0_5 = arith.constant 0 : index
    %c0_6 = arith.constant 0 : index
    %12 = vector.load %arg2[%c0_5, %c0_6] : memref<32x256xf32, #tpu.memory_space<vmem>>, vector<32x256xf32>
    %cst = arith.constant dense<0.000000e+00> : vector<8x256xf32>
    %13 = tpu.matmul %0, %12, %cst {dimension_numbers = #tpu.dot_dimension_numbers<[1], [0], [0], [1], [0, 0, 1, 1], [], []>} : vector<8x32xf32>, vector<32x256xf32>, vector<8x256xf32> -> vector<8x256xf32>
    %14 = vector.broadcast %3 : vector<1x256xf32> to vector<8x256xf32>
    %15 = arith.addf %13, %14 : vector<8x256xf32>
    %cst_7 = arith.constant 0.000000e+00 : f32
    %16 = vector.broadcast %cst_7 : f32 to vector<8x256xf32>
    %17 = arith.maximumf %15, %16 : vector<8x256xf32>
    %18 = vector.broadcast %4 : vector<1x256xf32> to vector<8x256xf32>
    %19 = arith.addf %17, %18 : vector<8x256xf32>
    %c0_8 = arith.constant 0 : index
    %c0_9 = arith.constant 0 : index
    %20 = vector.load %arg3[%c0_8, %c0_9] : memref<256x256xf32, #tpu.memory_space<vmem>>, vector<256x256xf32>
    %cst_10 = arith.constant dense<0.000000e+00> : vector<8x256xf32>
    %21 = tpu.matmul %19, %20, %cst_10 {dimension_numbers = #tpu.dot_dimension_numbers<[1], [0], [0], [1], [0, 0, 1, 1], [], []>} : vector<8x256xf32>, vector<256x256xf32>, vector<8x256xf32> -> vector<8x256xf32>
    %22 = vector.broadcast %5 : vector<1x256xf32> to vector<8x256xf32>
    %23 = arith.addf %21, %22 : vector<8x256xf32>
    %cst_11 = arith.constant 0.000000e+00 : f32
    %24 = vector.broadcast %cst_11 : f32 to vector<8x256xf32>
    %25 = arith.maximumf %23, %24 : vector<8x256xf32>
    %26 = vector.broadcast %6 : vector<1x256xf32> to vector<8x256xf32>
    %27 = arith.addf %25, %26 : vector<8x256xf32>
    %28 = arith.addf %27, %19 : vector<8x256xf32>
    %c0_12 = arith.constant 0 : index
    %c0_13 = arith.constant 0 : index
    %29 = vector.load %arg4[%c0_12, %c0_13] : memref<256x256xf32, #tpu.memory_space<vmem>>, vector<256x256xf32>
    %cst_14 = arith.constant dense<0.000000e+00> : vector<8x256xf32>
    %30 = tpu.matmul %28, %29, %cst_14 {dimension_numbers = #tpu.dot_dimension_numbers<[1], [0], [0], [1], [0, 0, 1, 1], [], []>} : vector<8x256xf32>, vector<256x256xf32>, vector<8x256xf32> -> vector<8x256xf32>
    %31 = vector.broadcast %7 : vector<1x256xf32> to vector<8x256xf32>
    %32 = arith.addf %30, %31 : vector<8x256xf32>
    %cst_15 = arith.constant 0.000000e+00 : f32
    %33 = vector.broadcast %cst_15 : f32 to vector<8x256xf32>
    %34 = arith.maximumf %32, %33 : vector<8x256xf32>
    %35 = vector.broadcast %8 : vector<1x256xf32> to vector<8x256xf32>
    %36 = arith.addf %34, %35 : vector<8x256xf32>
    %37 = arith.addf %36, %28 : vector<8x256xf32>
    %c0_16 = arith.constant 0 : index
    %c0_17 = arith.constant 0 : index
    %38 = vector.load %arg5[%c0_16, %c0_17] : memref<256x128xf32, #tpu.memory_space<vmem>>, vector<256x128xf32>
    %cst_18 = arith.constant dense<0.000000e+00> : vector<8x128xf32>
    %39 = tpu.matmul %37, %38, %cst_18 {dimension_numbers = #tpu.dot_dimension_numbers<[1], [0], [0], [1], [0, 0, 1, 1], [], []>} : vector<8x256xf32>, vector<256x128xf32>, vector<8x128xf32> -> vector<8x128xf32>
    %40 = vector.broadcast %9 : vector<1x128xf32> to vector<8x128xf32>
    %41 = arith.addf %39, %40 : vector<8x128xf32>
    %cst_19 = arith.constant 0.000000e+00 : f32
    %42 = vector.broadcast %cst_19 : f32 to vector<8x128xf32>
    %43 = arith.maximumf %41, %42 : vector<8x128xf32>
    %44 = vector.broadcast %10 : vector<1x128xf32> to vector<8x128xf32>
    %45 = arith.mulf %43, %44 : vector<8x128xf32>
    %cst_20 = arith.constant dense<0.000000e+00> : vector<8xf32>
    %46 = vector.multi_reduction <add>, %45, %cst_20 [1] : vector<8x128xf32> to vector<8xf32>
    %47 = vector.shape_cast %46 : vector<8xf32> to vector<8x1xf32>
    %48 = vector.broadcast %11 : vector<1x1xf32> to vector<8x1xf32>
    %49 = arith.addf %47, %48 : vector<8x1xf32>
    %c0_21 = arith.constant 0 : index
    %c0_22 = arith.constant 0 : index
    %50 = vector.load %arg8[%c0_21, %c0_22] : memref<8x1xf32, #tpu.memory_space<vmem>>, vector<8x1xf32>
    tpu.vector_store %arg8[%c0_21, %c0_22], %49 {strides = array<i32>} : memref<8x1xf32, #tpu.memory_space<vmem>>, vector<8x1xf32>,
    return
  }
  func.func @transform_0(%arg0: i32) -> (i32, i32) {
    %c0_i32 = arith.constant 0 : i32
    %c0_i32_0 = arith.constant 0 : i32
    return %arg0, %c0_i32 : i32, i32
  }
  func.func @transform_1(%arg0: i32) -> (i32, i32) {
    %c0_i32 = arith.constant 0 : i32
    %c0_i32_0 = arith.constant 0 : i32
    %c0_i32_1 = arith.constant 0 : i32
    return %c0_i32, %c0_i32_0 : i32, i32
  }
  func.func @transform_2(%arg0: i32) -> (i32, i32) {
    %c0_i32 = arith.constant 0 : i32
    %c0_i32_0 = arith.constant 0 : i32
    %c0_i32_1 = arith.constant 0 : i32
    return %c0_i32, %c0_i32_0 : i32, i32
  }
  func.func @transform_3(%arg0: i32) -> (i32, i32) {
    %c0_i32 = arith.constant 0 : i32
    %c0_i32_0 = arith.constant 0 : i32
    %c0_i32_1 = arith.constant 0 : i32
    return %c0_i32, %c0_i32_0 : i32, i32
  }
  func.func @transform_4(%arg0: i32) -> (i32, i32) {
    %c0_i32 = arith.constant 0 : i32
    %c0_i32_0 = arith.constant 0 : i32
    %c0_i32_1 = arith.constant 0 : i32
    return %c0_i32, %c0_i32_0 : i32, i32
  }
  func.func @transform_5(%arg0: i32) -> (i32, i32) {
    %c0_i32 = arith.constant 0 : i32
    %c0_i32_0 = arith.constant 0 : i32
    %c0_i32_1 = arith.constant 0 : i32
    return %c0_i32, %c0_i32_0 : i32, i32
  }
  func.func @transform_6(%arg0: i32) -> (i32, i32) {
    %c0_i32 = arith.constant 0 : i32
    %c0_i32_0 = arith.constant 0 : i32
    %c0_i32_1 = arith.constant 0 : i32
    return %c0_i32, %c0_i32_0 : i32, i32
  }
  func.func @transform_7(%arg0: i32) -> (i32, i32) {
    %c0_i32 = arith.constant 0 : i32
    %c0_i32_0 = arith.constant 0 : i32
    return %arg0, %c0_i32 : i32, i32
  }
}

</mosaic_0001>

<bundles_post_ra>
// kernel: deep_residual_mlp.1
= control target key start
LH: loop header
LB: loop body
LE: loop exit
PB: predicated region body
PF: predicated region fallthrough
CT: control target
= control target key end

     0   :  { %12 = vsyncpa [#allocation3], 0  ;;  %s960_s0 = inlined_call_operand.hbm [shape: f32[8,32], index: 0, kind: input, shape index: {}]   ;;  %s961_s1 = inlined_call_operand.hbm [shape: f32[32,256], index: 1, kind: input, shape index: {}]   ;;  %s962_s2 = inlined_call_operand.hbm [shape: f32[256,256], index: 2, kind: input, shape index: {}]   ;;  %s963_s3 = inlined_call_operand.hbm [shape: f32[256,256], index: 3, kind: input, shape index: {}]   ;;  %s964_s4 = inlined_call_operand.hbm [shape: f32[256,128], index: 4, kind: input, shape index: {}]   ;;  %s965_s5 = inlined_call_operand.hbm [shape: f32[6,256], index: 5, kind: input, shape index: {}]   ;;  %s966_s6 = inlined_call_operand.vmem [shape: f32[3,128], index: 6, kind: input, shape index: {}]   ;;  %s967_s7 = inlined_call_operand.vmem [shape: f32[8,1], index: 7, kind: output, shape index: {}]  }
   0x1   :  { %13 = vsyncpa [#allocation5], 0 }
   0x2   :  { %14 = vsyncpa [#allocation8], 0 }
   0x3   :  { %15 = vsyncpa [#allocation11], 0  ;;  %s829_s24 = smov [#allocation4]  }
   0x4   :  { %s31_s25 = sshll.u32 %s829_s24, 4  ;;  %s32_s25 = int_to_ptr.vmem [resolvable:$true] %s31_s25 }
   0x5   :  { %s709_s26 = scalar_lea.vmem %s32_s25, 1024  ;;  %p714_p1 = scmp.lt.s32.totalorder %s32_s25, %s32_s25 }
   0x6   :  { %p710_p0 = scmp.ne.s32.totalorder %s32_s25, %s709_s26  ;;  %p715_p2 = scmp.lt.s32.totalorder %s709_s26, %s709_s26 }
   0x8   :  { %p716_p3 = por %p715_p2, %p714_p1 }
   0xa   :  { %p717_p4 = pnand %p716_p3, %p710_p0 }
   0xc   :  { %720 = shalt.err (!%p717_p4)
}
   0xd   :  { %s830_s27 = smov 256   ;;  %s831_s28 = smov 16  }
   0xe   :  { %37 = dma.hbm_to_vmem [thread:$0]  %s961_s1, 1024, %s32_s25, [#allocation5], %s830_s27, %s830_s27, %s831_s28  }
   0xf   :  { %s832_s8 = smov [#allocation7]   ;;  %s833_s10 = smov [#allocation2]  }
  0x10   :  { %s55_s9 = sshll.u32 %s832_s8, 4  ;;  %s22_s11 = sshll.u32 %s833_s10, 4  ;;  %s56_s9 = int_to_ptr.vmem [resolvable:$true] %s55_s9  ;;  %s23_s11 = int_to_ptr.vmem [resolvable:$true] %s22_s11 }
  0x11   :  { %s729_s12 = scalar_lea.vmem %s56_s9, 8192  ;;  %p734_p6 = scmp.lt.s32.totalorder %s56_s9, %s56_s9 }
  0x12   :  { %p730_p5 = scmp.ne.s32.totalorder %s56_s9, %s729_s12  ;;  %p735_p7 = scmp.lt.s32.totalorder %s729_s12, %s729_s12 }
  0x14   :  { %p736_p8 = por %p735_p7, %p734_p6 }
  0x16   :  { %p737_p9 = pnand %p736_p8, %p730_p5 }
  0x18   :  { %740 = shalt.err (!%p737_p9)
}
  0x19   :  { %61 = dma.hbm_to_vmem [thread:$0]  %s963_s3, 8192, %s56_s9, [#allocation8], %s830_s27, %s830_s27, %s831_s28  }
  0x1a   :  { %s749_s1 = scalar_lea.vmem %s23_s11, 128  ;;  %p754_p11 = scmp.lt.s32.totalorder %s23_s11, %s23_s11 }
  0x1b   :  { %p750_p10 = scmp.ne.s32.totalorder %s23_s11, %s749_s1  ;;  %p755_p12 = scmp.lt.s32.totalorder %s749_s1, %s749_s1 }
  0x1d   :  { %p756_p13 = por %p755_p12, %p754_p11 }
  0x1f   :  { %p757_p0 = pnand %p756_p13, %p750_p10 }
  0x21   :  { %760 = shalt.err (!%p757_p0)
}
  0x22   :  { %25 = dma.hbm_to_vmem [thread:$0]  %s960_s0, 128, %s23_s11, [#allocation3]  }
  0x23   :  { %s834_s17 = smov [#allocation6]   ;;  %s835_s19 = smov [#allocation9]  }
  0x24   :  { %s43_s18 = sshll.u32 %s834_s17, 4  ;;  %s67_s20 = sshll.u32 %s835_s19, 4  ;;  %s44_s18 = int_to_ptr.vmem [resolvable:$true] %s43_s18  ;;  %s68_s20 = int_to_ptr.vmem [resolvable:$true] %s67_s20 }
  0x25   :  { %s769_s21 = scalar_lea.vmem %s44_s18, 8192  ;;  %p774_p2 = scmp.lt.s32.totalorder %s44_s18, %s44_s18 }
  0x26   :  { %p770_p1 = scmp.ne.s32.totalorder %s44_s18, %s769_s21  ;;  %p775_p3 = scmp.lt.s32.totalorder %s769_s21, %s769_s21 }
  0x28   :  { %p776_p4 = por %p775_p3, %p774_p2 }
  0x2a   :  { %p777_p5 = pnand %p776_p4, %p770_p1 }
  0x2c   :  { %780 = shalt.err (!%p777_p5)
}
  0x2d   :  { %49 = dma.hbm_to_vmem [thread:$0]  %s962_s2, 8192, %s44_s18, [#allocation5], %s830_s27, %s830_s27, %s831_s28  }
  0x2e   :  { %s789_s0 = scalar_lea.vmem %s68_s20, 4096  ;;  %p794_p7 = scmp.lt.s32.totalorder %s68_s20, %s68_s20 }
  0x2f   :  { %p790_p6 = scmp.ne.s32.totalorder %s68_s20, %s789_s0  ;;  %p795_p8 = scmp.lt.s32.totalorder %s789_s0, %s789_s0 }
  0x31   :  { %p796_p9 = por %p795_p8, %p794_p7 }
  0x33   :  { %p797_p10 = pnand %p796_p9, %p790_p6 }
  0x35   :  { %800 = shalt.err (!%p797_p10)
}
  0x36   :  { %s836_s23 = smov 128   ;;  %s837_s24 = smov 8  }
  0x37   :  { %73 = dma.hbm_to_vmem [thread:$0]  %s964_s4, 4096, %s68_s20, [#allocation8], %s836_s23, %s836_s23, %s837_s24  }
  0x38   :  { %s838_s29 = smov [#allocation10]  }
  0x39   :  { %s80_s30 = sshll.u32 %s838_s29, 4  ;;  %s81_s30 = int_to_ptr.vmem [resolvable:$true] %s80_s30 }
  0x3a   :  { %s809_s8 = scalar_lea.vmem %s81_s30, 256  ;;  %p814_p12 = scmp.lt.s32.totalorder %s81_s30, %s81_s30 }
  0x3b   :  { %p810_p11 = scmp.ne.s32.totalorder %s81_s30, %s809_s8  ;;  %p815_p13 = scmp.lt.s32.totalorder %s809_s8, %s809_s8 }
  0x3d   :  { %p816_p0 = por %p815_p13, %p814_p12 }
  0x3f   :  { %p817_p1 = pnand %p816_p0, %p810_p11 }
  0x41   :  { %820 = shalt.err (!%p817_p1)
}
  0x42   :  { %83 = dma.hbm_to_vmem [thread:$0]  %s965_s5, 256, %s81_s30, [#allocation11]  }
  0x43   :  { %821 = dma.done.wait [#allocation3], 128  }
  0x44   :  { %822 = vsyncadd [#allocation3], 4294967168 }
  0x45   :  { %823 = dma.done.wait [#allocation5], 9216  }
  0x46   :  { %824 = vsyncadd [#allocation5], 4294958080 }
  0x47   :  { %825 = dma.done.wait [#allocation8], 12288  }
  0x48   :  { %826 = vsyncadd [#allocation8], 4294955008 }
  0x49   :  { %827 = dma.done.wait [#allocation11], 256  }
  0x4a   :  { %828 = vsyncadd [#allocation11], 4294967040  ;;  %v839_v0 = vmov 0.0   ;;  %v115_v1 = vld [vmem:[#allocation4 + $0x38] sm:$0xff]  ;;  %v114_v2 = vld [vmem:[#allocation4 + $0x30] sm:$0xff]  ;;  %vm124_vm0 = vcmask 261120  }
  0x4b   :  { %192 = vmatprep.mubr.f32.mxu0 %v839_v0  ;;  %v113_v3 = vld [vmem:[#allocation4 + $0x28] sm:$0xff]  ;;  %152 = vmatprep.subr.mxu0 %v115_v1  ;;  %v112_v4 = vld [vmem:[#allocation4 + $0x20] sm:$0xff]  ;;  %v111_v5 = vld [vmem:[#allocation4 + $0x18] sm:$0xff]  ;;  %vm644_vm1 = vcmask 7168  }
  0x4c   :  { %153 = vmatpush1.msra.mxu0 %v114_v2  ;;  %v110_v6 = vld [vmem:[#allocation4 + $0x10] sm:$0xff]  ;;  %v242_v7 = vld [vmem:[#allocation6 + $0xf8] sm:$0xff]  ;;  %v240_v9 = vld [vmem:[#allocation6 + $0xe8] sm:$0xff] }
  0x4d   :  { %154 = vmatprep.subr.mxu0 %v113_v3  ;;  %v241_v8 = vld [vmem:[#allocation6 + $0xf0] sm:$0xff]  ;;  %v109_v10 = vld [vmem:[#allocation4 + $0x8] sm:$0xff]  ;;  %283 = vmatprep.subr.mxu1 %v242_v7  ;;  %v239_v11 = vld [vmem:[#allocation6 + $0xe0] sm:$0xff] }
  0x4e   :  { %155 = vmatpush1.msra.mxu0 %v112_v4  ;;  %v108_v12 = vld [vmem:[#allocation4] sm:$0xff]  ;;  %284 = vmatpush1.msra.mxu1 %v241_v8  ;;  %v238_v13 = vld [vmem:[#allocation6 + $0xd8] sm:$0xff]  ;;  %v237_v15 = vld [vmem:[#allocation6 + $0xd0] sm:$0xff] }
  0x4f   :  { %156 = vmatprep.subr.mxu0 %v111_v5  ;;  %v104_v14 = vld [vmem:[#allocation2] sm:$0xff]  ;;  %285 = vmatprep.subr.mxu1 %v240_v9  ;;  %v236_v16 = vld [vmem:[#allocation6 + $0xc8] sm:$0xff]  ;;  %v235_v17 = vld [vmem:[#allocation6 + $0xc0] sm:$0xff] }
  0x50   :  { %157 = vmatpush1.msra.mxu0 %v110_v6  ;;  %286 = vmatpush1.msra.mxu1 %v239_v11  ;;  %v234_v18 = vld [vmem:[#allocation6 + $0xb8] sm:$0xff]  ;;  %v233_v19 = vld [vmem:[#allocation6 + $0xb0] sm:$0xff]  ;;  %v232_v20 = vld [vmem:[#allocation6 + $0xa8] sm:$0xff] }
  0x51   :  { %158 = vmatprep.subr.mxu0 %v109_v10  ;;  %287 = vmatprep.subr.mxu1 %v238_v13  ;;  %v231_v21 = vld [vmem:[#allocation6 + $0xa0] sm:$0xff]  ;;  %v230_v22 = vld [vmem:[#allocation6 + $0x98] sm:$0xff]  ;;  %v229_v23 = vld [vmem:[#allocation6 + $0x90] sm:$0xff] }
  0x52   :  { %159 = vmatpush1.msra.mxu0 %v108_v12  ;;  %288 = vmatpush1.msra.mxu1 %v237_v15  ;;  %v228_v24 = vld [vmem:[#allocation6 + $0x88] sm:$0xff]  ;;  %v227_v25 = vld [vmem:[#allocation6 + $0x80] sm:$0xff]  ;;  %v226_v26 = vld [vmem:[#allocation6 + $0x78] sm:$0xff] }
  0x53   :  { %654 = vmatmul.mubr.msk.f32.vlgmr.msra.gmra.mxu0 %vm124_vm0, %v104_v14  ;;  %289 = vmatprep.subr.mxu1 %v236_v16  ;;  %v225_v27 = vld [vmem:[#allocation6 + $0x70] sm:$0xff]  ;;  %v224_v28 = vld [vmem:[#allocation6 + $0x68] sm:$0xff]  ;;  %v223_v29 = vld [vmem:[#allocation6 + $0x60] sm:$0xff] }
  0x54   :  { %290 = vmatpush1.msra.mxu1 %v235_v17  ;;  %v222_v30 = vld [vmem:[#allocation6 + $0x58] sm:$0xff]  ;;  %v221_v31 = vld [vmem:[#allocation6 + $0x50] sm:$0xff]  ;;  %v220_v32 = vld [vmem:[#allocation6 + $0x48] sm:$0xff] }
  0x55   :  { %291 = vmatprep.subr.mxu1 %v234_v18  ;;  %v219_v33 = vld [vmem:[#allocation6 + $0x40] sm:$0xff]  ;;  %v218_v34 = vld [vmem:[#allocation6 + $0x38] sm:$0xff]  ;;  %v217_v35 = vld [vmem:[#allocation6 + $0x30] sm:$0xff] }
  0x56   :  { %292 = vmatpush1.msra.mxu1 %v233_v19  ;;  %v216_v36 = vld [vmem:[#allocation6 + $0x28] sm:$0xff]  ;;  %v215_v37 = vld [vmem:[#allocation6 + $0x20] sm:$0xff]  ;;  %v214_v38 = vld [vmem:[#allocation6 + $0x18] sm:$0xff] }
  0x57   :  { %293 = vmatprep.subr.mxu1 %v232_v20  ;;  %v213_v39 = vld [vmem:[#allocation6 + $0x10] sm:$0xff]  ;;  %v212_v40 = vld [vmem:[#allocation6 + $0x8] sm:$0xff]  ;;  %v211_v41 = vld [vmem:[#allocation6] sm:$0xff] }
  0x58   :  { %294 = vmatpush1.msra.mxu1 %v231_v21  ;;  %v274_v42 = vld [vmem:[#allocation6 + $0x1f8] sm:$0xff]  ;;  %v273_v43 = vld [vmem:[#allocation6 + $0x1f0] sm:$0xff]  ;;  %v272_v44 = vld [vmem:[#allocation6 + $0x1e8] sm:$0xff] }
  0x59   :  { %295 = vmatprep.subr.mxu1 %v230_v22  ;;  %v271_v45 = vld [vmem:[#allocation6 + $0x1e0] sm:$0xff]  ;;  %v270_v46 = vld [vmem:[#allocation6 + $0x1d8] sm:$0xff]  ;;  %v269_v47 = vld [vmem:[#allocation6 + $0x1d0] sm:$0xff] }
  0x5a   :  { %296 = vmatpush1.msra.mxu1 %v229_v23  ;;  %v268_v48 = vld [vmem:[#allocation6 + $0x1c8] sm:$0xff]  ;;  %v267_v49 = vld [vmem:[#allocation6 + $0x1c0] sm:$0xff]  ;;  %v266_v50 = vld [vmem:[#allocation6 + $0x1b8] sm:$0xff] }
  0x5b   :  { %297 = vmatprep.subr.mxu1 %v228_v24  ;;  %v265_v51 = vld [vmem:[#allocation6 + $0x1b0] sm:$0xff]  ;;  %v264_v52 = vld [vmem:[#allocation6 + $0x1a8] sm:$0xff]  ;;  %v263_v53 = vld [vmem:[#allocation6 + $0x1a0] sm:$0xff] }
  0x5c   :  { %298 = vmatpush1.msra.mxu1 %v227_v25  ;;  %v262_v54 = vld [vmem:[#allocation6 + $0x198] sm:$0xff]  ;;  %v261_v55 = vld [vmem:[#allocation6 + $0x190] sm:$0xff]  ;;  %v260_v56 = vld [vmem:[#allocation6 + $0x188] sm:$0xff] }
  0x5d   :  { %299 = vmatprep.subr.mxu1 %v226_v26  ;;  %v259_v57 = vld [vmem:[#allocation6 + $0x180] sm:$0xff]  ;;  %v258_v58 = vld [vmem:[#allocation6 + $0x178] sm:$0xff]  ;;  %v257_v59 = vld [vmem:[#allocation6 + $0x170] sm:$0xff] }
  0x5e   :  { %300 = vmatpush1.msra.mxu1 %v225_v27  ;;  %v256_v60 = vld [vmem:[#allocation6 + $0x168] sm:$0xff]  ;;  %v255_v61 = vld [vmem:[#allocation6 + $0x160] sm:$0xff]  ;;  %v254_v62 = vld [vmem:[#allocation6 + $0x158] sm:$0xff] }
  0x5f   :  { %301 = vmatprep.subr.mxu1 %v224_v28  ;;  %v253_v63 = vld [vmem:[#allocation6 + $0x150] sm:$0xff]  ;;  %v252_v0 = vld [vmem:[#allocation6 + $0x148] sm:$0xff]  ;;  %v251_v1 = vld [vmem:[#allocation6 + $0x140] sm:$0xff] }
  0x60   :  { %302 = vmatpush1.msra.mxu1 %v223_v29  ;;  %v250_v2 = vld [vmem:[#allocation6 + $0x138] sm:$0xff]  ;;  %v249_v3 = vld [vmem:[#allocation6 + $0x130] sm:$0xff]  ;;  %v248_v4 = vld [vmem:[#allocation6 + $0x128] sm:$0xff] }
  0x61   :  { %303 = vmatprep.subr.mxu1 %v222_v30  ;;  %v247_v5 = vld [vmem:[#allocation6 + $0x120] sm:$0xff]  ;;  %v246_v6 = vld [vmem:[#allocation6 + $0x118] sm:$0xff]  ;;  %v245_v7 = vld [vmem:[#allocation6 + $0x110] sm:$0xff] }
  0x62   :  { %304 = vmatpush1.msra.mxu1 %v221_v31  ;;  %v244_v8 = vld [vmem:[#allocation6 + $0x108] sm:$0xff]  ;;  %v243_v9 = vld [vmem:[#allocation6 + $0x100] sm:$0xff]  ;;  %v399_v10 = vld [vmem:[#allocation7 + $0xf8] sm:$0xff] }
  0x63   :  { %305 = vmatprep.subr.mxu1 %v220_v32  ;;  %v398_v11 = vld [vmem:[#allocation7 + $0xf0] sm:$0xff]  ;;  %v397_v12 = vld [vmem:[#allocation7 + $0xe8] sm:$0xff]  ;;  %440 = vmatprep.subr.mxu0 %v399_v10  ;;  %v396_v13 = vld [vmem:[#allocation7 + $0xe0] sm:$0xff] }
  0x64   :  { %306 = vmatpush1.msra.mxu1 %v219_v33  ;;  %441 = vmatpush1.msra.mxu0 %v398_v11  ;;  %v395_v14 = vld [vmem:[#allocation7 + $0xd8] sm:$0xff]  ;;  %v394_v15 = vld [vmem:[#allocation7 + $0xd0] sm:$0xff]  ;;  %v393_v16 = vld [vmem:[#allocation7 + $0xc8] sm:$0xff] }
  0x65   :  { %307 = vmatprep.subr.mxu1 %v218_v34  ;;  %442 = vmatprep.subr.mxu0 %v397_v12  ;;  %v392_v17 = vld [vmem:[#allocation7 + $0xc0] sm:$0xff]  ;;  %v391_v18 = vld [vmem:[#allocation7 + $0xb8] sm:$0xff]  ;;  %v390_v19 = vld [vmem:[#allocation7 + $0xb0] sm:$0xff] }
  0x66   :  { %308 = vmatpush1.msra.mxu1 %v217_v35  ;;  %443 = vmatpush1.msra.mxu0 %v396_v13  ;;  %v389_v20 = vld [vmem:[#allocation7 + $0xa8] sm:$0xff]  ;;  %v388_v21 = vld [vmem:[#allocation7 + $0xa0] sm:$0xff]  ;;  %v387_v22 = vld [vmem:[#allocation7 + $0x98] sm:$0xff] }
  0x67   :  { %309 = vmatprep.subr.mxu1 %v216_v36  ;;  %444 = vmatprep.subr.mxu0 %v395_v14  ;;  %v386_v23 = vld [vmem:[#allocation7 + $0x90] sm:$0xff]  ;;  %v385_v24 = vld [vmem:[#allocation7 + $0x88] sm:$0xff]  ;;  %v384_v25 = vld [vmem:[#allocation7 + $0x80] sm:$0xff] }
  0x68   :  { %310 = vmatpush1.msra.mxu1 %v215_v37  ;;  %445 = vmatpush1.msra.mxu0 %v394_v15  ;;  %v383_v26 = vld [vmem:[#allocation7 + $0x78] sm:$0xff]  ;;  %v382_v27 = vld [vmem:[#allocation7 + $0x70] sm:$0xff]  ;;  %v381_v28 = vld [vmem:[#allocation7 + $0x68] sm:$0xff] }
  0x69   :  { %311 = vmatprep.subr.mxu1 %v214_v38  ;;  %446 = vmatprep.subr.mxu0 %v393_v16  ;;  %v380_v29 = vld [vmem:[#allocation7 + $0x60] sm:$0xff]  ;;  %v379_v30 = vld [vmem:[#allocation7 + $0x58] sm:$0xff]  ;;  %v378_v31 = vld [vmem:[#allocation7 + $0x50] sm:$0xff] }
  0x6a   :  { %312 = vmatpush1.msra.mxu1 %v213_v39  ;;  %447 = vmatpush1.msra.mxu0 %v392_v17  ;;  %v377_v32 = vld [vmem:[#allocation7 + $0x48] sm:$0xff]  ;;  %v376_v33 = vld [vmem:[#allocation7 + $0x40] sm:$0xff]  ;;  %v375_v34 = vld [vmem:[#allocation7 + $0x38] sm:$0xff] }
  0x6b   :  { %313 = vmatprep.subr.mxu1 %v212_v40  ;;  %448 = vmatprep.subr.mxu0 %v391_v18  ;;  %v374_v35 = vld [vmem:[#allocation7 + $0x30] sm:$0xff]  ;;  %v373_v36 = vld [vmem:[#allocation7 + $0x28] sm:$0xff]  ;;  %v372_v37 = vld [vmem:[#allocation7 + $0x20] sm:$0xff] }
  0x6c   :  { %314 = vmatpush1.msra.mxu1 %v211_v41  ;;  %449 = vmatpush1.msra.mxu0 %v390_v19  ;;  %v371_v38 = vld [vmem:[#allocation7 + $0x18] sm:$0xff]  ;;  %v370_v39 = vld [vmem:[#allocation7 + $0x10] sm:$0xff]  ;;  %v369_v40 = vld [vmem:[#allocation7 + $0x8] sm:$0xff] }
  0x6d   :  { %315 = vmatprep.subr.mxu1 %v274_v42  ;;  %450 = vmatprep.subr.mxu0 %v389_v20  ;;  %v368_v41 = vld [vmem:[#allocation7] sm:$0xff]  ;;  %v431_v42 = vld [vmem:[#allocation7 + $0x1f8] sm:$0xff]  ;;  %v410_v17 = vld [vmem:[#allocation7 + $0x150] sm:$0xff] }
  0x6e   :  { %316 = vmatpush2.msra.mxu1 %v273_v43  ;;  %451 = vmatpush1.msra.mxu0 %v388_v21  ;;  %v430_v43 = vld [vmem:[#allocation7 + $0x1f0] sm:$0xff]  ;;  %v411_v16 = vld [vmem:[#allocation7 + $0x158] sm:$0xff]  ;;  %v409_v18 = vld [vmem:[#allocation7 + $0x148] sm:$0xff] }
  0x6f   :  { %317 = vmatprep.subr.mxu1 %v272_v44  ;;  %452 = vmatprep.subr.mxu0 %v387_v22  ;;  %v429_v44 = vld [vmem:[#allocation7 + $0x1e8] sm:$0xff]  ;;  %v408_v19 = vld [vmem:[#allocation7 + $0x140] sm:$0xff]  ;;  %v407_v20 = vld [vmem:[#allocation7 + $0x138] sm:$0xff] }
  0x70   :  { %318 = vmatpush2.msra.mxu1 %v271_v45  ;;  %453 = vmatpush1.msra.mxu0 %v386_v23  ;;  %v428_v45 = vld [vmem:[#allocation7 + $0x1e0] sm:$0xff]  ;;  %v406_v21 = vld [vmem:[#allocation7 + $0x130] sm:$0xff]  ;;  %v405_v22 = vld [vmem:[#allocation7 + $0x128] sm:$0xff] }
  0x71   :  { %319 = vmatprep.subr.mxu1 %v270_v46  ;;  %454 = vmatprep.subr.mxu0 %v385_v24  ;;  %v427_v46 = vld [vmem:[#allocation7 + $0x1d8] sm:$0xff]  ;;  %v404_v23 = vld [vmem:[#allocation7 + $0x120] sm:$0xff] }
  0x72   :  { %320 = vmatpush2.msra.mxu1 %v269_v47  ;;  %455 = vmatpush1.msra.mxu0 %v384_v25  ;;  %v426_v47 = vld [vmem:[#allocation7 + $0x1d0] sm:$0xff]  ;;  %v403_v24 = vld [vmem:[#allocation7 + $0x118] sm:$0xff] }
  0x73   :  { %321 = vmatprep.subr.mxu1 %v268_v48  ;;  %456 = vmatprep.subr.mxu0 %v383_v26  ;;  %v425_v48 = vld [vmem:[#allocation7 + $0x1c8] sm:$0xff]  ;;  %v402_v25 = vld [vmem:[#allocation7 + $0x110] sm:$0xff] }
  0x74   :  { %322 = vmatpush2.msra.mxu1 %v267_v49  ;;  %457 = vmatpush1.msra.mxu0 %v382_v27  ;;  %v424_v49 = vld [vmem:[#allocation7 + $0x1c0] sm:$0xff]  ;;  %v401_v26 = vld [vmem:[#allocation7 + $0x108] sm:$0xff] }
  0x75   :  { %323 = vmatprep.subr.mxu1 %v266_v50  ;;  %458 = vmatprep.subr.mxu0 %v381_v28  ;;  %v423_v50 = vld [vmem:[#allocation7 + $0x1b8] sm:$0xff]  ;;  %v400_v27 = vld [vmem:[#allocation7 + $0x100] sm:$0xff] }
  0x76   :  { %324 = vmatpush2.msra.mxu1 %v265_v51  ;;  %459 = vmatpush1.msra.mxu0 %v380_v29  ;;  %v422_v51 = vld [vmem:[#allocation7 + $0x1b0] sm:$0xff]  ;;  %v556_v28 = vld [vmem:[#allocation9 + $0xf8] sm:$0xff] }
  0x77   :  { %325 = vmatprep.subr.mxu1 %v264_v52  ;;  %460 = vmatprep.subr.mxu0 %v379_v30  ;;  %v421_v52 = vld [vmem:[#allocation7 + $0x1a8] sm:$0xff]  ;;  %v540_v29 = vld [vmem:[#allocation9 + $0x78] sm:$0xff]  ;;  %v555_v30 = vld [vmem:[#allocation9 + $0xf0] sm:$0xff] }
  0x78   :  { %326 = vmatpush2.msra.mxu1 %v263_v53  ;;  %461 = vmatpush1.msra.mxu0 %v378_v31  ;;  %v420_v53 = vld [vmem:[#allocation7 + $0x1a0] sm:$0xff]  ;;  %v539_v31 = vld [vmem:[#allocation9 + $0x70] sm:$0xff] }
  0x79   :  { %327 = vmatprep.subr.mxu1 %v262_v54  ;;  %462 = vmatprep.subr.mxu0 %v377_v32  ;;  %v419_v54 = vld [vmem:[#allocation7 + $0x198] sm:$0xff]  ;;  %v554_v32 = vld [vmem:[#allocation9 + $0xe8] sm:$0xff] }
  0x7a   :  { %328 = vmatpush2.msra.mxu1 %v261_v55  ;;  %463 = vmatpush1.msra.mxu0 %v376_v33  ;;  %v418_v55 = vld [vmem:[#allocation7 + $0x190] sm:$0xff]  ;;  %v538_v33 = vld [vmem:[#allocation9 + $0x68] sm:$0xff] }
  0x7b   :  { %329 = vmatprep.subr.mxu1 %v260_v56  ;;  %464 = vmatprep.subr.mxu0 %v375_v34  ;;  %v417_v56 = vld [vmem:[#allocation7 + $0x188] sm:$0xff]  ;;  %v553_v34 = vld [vmem:[#allocation9 + $0xe0] sm:$0xff] }
  0x7c   :  { %330 = vmatpush2.msra.mxu1 %v259_v57  ;;  %465 = vmatpush1.msra.mxu0 %v374_v35  ;;  %v416_v57 = vld [vmem:[#allocation7 + $0x180] sm:$0xff] }
  0x7d   :  { %331 = vmatprep.subr.mxu1 %v258_v58  ;;  %466 = vmatprep.subr.mxu0 %v373_v36  ;;  %v415_v58 = vld [vmem:[#allocation7 + $0x178] sm:$0xff]  ;;  %v537_v35 = vld [vmem:[#allocation9 + $0x60] sm:$0xff] }
  0x7e   :  { %332 = vmatpush2.msra.mxu1 %v257_v59  ;;  %467 = vmatpush1.msra.mxu0 %v372_v37  ;;  %v414_v59 = vld [vmem:[#allocation7 + $0x170] sm:$0xff]  ;;  %v552_v36 = vld [vmem:[#allocation9 + $0xd8] sm:$0xff] }
  0x7f   :  { %333 = vmatprep.subr.mxu1 %v256_v60  ;;  %468 = vmatprep.subr.mxu0 %v371_v38  ;;  %v413_v60 = vld [vmem:[#allocation7 + $0x168] sm:$0xff]  ;;  %v536_v37 = vld [vmem:[#allocation9 + $0x58] sm:$0xff]  ;;  %v551_v38 = vld [vmem:[#allocation9 + $0xd0] sm:$0xff] }
  0x80   :  { %334 = vmatpush2.msra.mxu1 %v255_v61  ;;  %469 = vmatpush1.msra.mxu0 %v370_v39  ;;  %v412_v61 = vld [vmem:[#allocation7 + $0x160] sm:$0xff]  ;;  %v535_v39 = vld [vmem:[#allocation9 + $0x50] sm:$0xff] }
  0x81   :  { %335 = vmatprep.subr.mxu1 %v254_v62  ;;  %470 = vmatprep.subr.mxu0 %v369_v40  ;;  %v116_v62 = vlaneseq  ;;  %v550_v40 = vld [vmem:[#allocation9 + $0xc8] sm:$0xff] }
  0x82   :  { %336 = vmatpush2.msra.mxu1 %v253_v63  ;;  %471 = vmatpush1.msra.mxu0 %v368_v41  ;;  %v534_v41 = vld [vmem:[#allocation9 + $0x48] sm:$0xff] }
  0x83   :  { %337 = vmatprep.subr.mxu1 %v252_v0  ;;  %472 = vmatprep.subr.mxu0 %v431_v42  ;;  %v907_v63 = vshrl.u32 %v116_v62, 7  ;;  %v549_v42 = vld [vmem:[#allocation9 + $0xc0] sm:$0xff] }
  0x84   :  { %338 = vmatpush2.msra.mxu1 %v251_v1  ;;  %473 = vmatpush2.msra.mxu0 %v430_v43  ;;  %v912_v1 = vld [vmem:[#allocation10] sm:$0x3f] }
  0x85   :  { %339 = vmatprep.subr.mxu1 %v250_v2  ;;  %474 = vmatprep.subr.mxu0 %v429_v44  ;;  %v910_v0 = vsub.s32 0, %v907_v63  ;;  %v914_v2 = vld [vmem:[#allocation10 + $0x8] sm:$0x3f]  ;;  %v533_v43 = vld [vmem:[#allocation9 + $0x40] sm:$0xff]  ;;  %v548_v44 = vld [vmem:[#allocation9 + $0xb8] sm:$0xff] }
  0x86   :  { %340 = vmatpush2.msra.mxu1 %v249_v3  ;;  %475 = vmatpush2.msra.mxu0 %v428_v45  ;;  %v532_v45 = vld [vmem:[#allocation9 + $0x38] sm:$0xff] }
  0x87   :  { %341 = vmatprep.subr.mxu1 %v248_v4  ;;  %476 = vmatprep.subr.mxu0 %v427_v46  ;;  %v119_v3 = vrot.slane %v912_v1, %v910_v0  ;;  %v123_v4 = vrot.slane %v914_v2, %v910_v0  ;;  %v547_v46 = vld [vmem:[#allocation9 + $0xb0] sm:$0xff] }
  0x88   :  { %342 = vmatpush2.msra.mxu1 %v247_v5  ;;  %477 = vmatpush2.msra.mxu0 %v426_v47  ;;  %v531_v47 = vld [vmem:[#allocation9 + $0x30] sm:$0xff] }
  0x89   :  { %343 = vmatprep.subr.mxu1 %v246_v6  ;;  %478 = vmatprep.subr.mxu0 %v425_v48  ;;  %v921_v6 = vsub.s32 1, %v907_v63  ;;  %v934_v48 = vsub.s32 2, %v907_v63 }
  0x8a   :  { %344 = vmatpush2.msra.mxu1 %v245_v7  ;;  %479 = vmatpush2.msra.mxu0 %v424_v49 }
  0x8b   :  { %345 = vmatprep.subr.mxu1 %v244_v8  ;;  %480 = vmatprep.subr.mxu0 %v423_v50  ;;  %v208_v10 = vrot.slane %v914_v2, %v921_v6  ;;  %v204_v12 = vrot.slane %v912_v1, %v921_v6  ;;  %v278_v49 = vrot.slane %v912_v1, %v934_v48  ;;  %v358_v50 = vsub.s32 3, %v907_v63 }
  0x8c   :  { %346 = vmatpush2.msra.mxu1 %v243_v9  ;;  %481 = vmatpush2.msra.mxu0 %v422_v51  ;;  %v282_v51 = vrot.slane %v914_v2, %v934_v48 }
  0x8d   :  { %482 = vmatprep.subr.mxu0 %v421_v52  ;;  %655 = vmatprep.subr.mxu1 %v556_v28 }
  0x8e   :  { %483 = vmatpush2.msra.mxu0 %v420_v53 }
  0x8f   :  { %484 = vmatprep.subr.mxu0 %v419_v54  ;;  %v359_v54 = vrot.slane %v912_v1, %v358_v50 }
  0x90   :  { %485 = vmatpush2.msra.mxu0 %v418_v55 }
  0x91   :  { %486 = vmatprep.subr.mxu0 %v417_v56 }
  0x92   :  { %487 = vmatpush2.msra.mxu0 %v416_v57 }
  0x93   :  { %488 = vmatprep.subr.mxu0 %v415_v58  ;;  %v363_v58 = vrot.slane %v914_v2, %v358_v50 }
  0x94   :  { %489 = vmatpush2.msra.mxu0 %v414_v59 }
  0x95   :  { %490 = vmatprep.subr.mxu0 %v413_v60 }
  0x96   :  { %491 = vmatpush2.msra.mxu0 %v412_v61 }
  0x97   :  { %492 = vmatprep.subr.mxu0 %v411_v16  ;;  %v525_v16 = vld [vmem:[#allocation9] sm:$0xff] }
  0x98   :  { %493 = vmatpush2.msra.mxu0 %v410_v17  ;;  %v434_v17 = vsub.s32 4, %v907_v63 }
  0x99   :  { %494 = vmatprep.subr.mxu0 %v409_v18 }
  0x9a   :  { %495 = vmatpush2.msra.mxu0 %v408_v19  ;;  %v435_v18 = vrot.slane %v912_v1, %v434_v17  ;;  %v515_v19 = vsub.s32 5, %v907_v63  ;;  %v107_v63 = vld [vmem:[%s966_s6] sm:$0x7] }
  0x9b   :  { %496 = vmatprep.subr.mxu0 %v407_v20  ;;  %v439_v20 = vrot.slane %v914_v2, %v434_v17 }
  0x9c   :  { %497 = vmatpush2.msra.mxu0 %v406_v21 }
  0x9d   :  { %498 = vmatprep.subr.mxu0 %v405_v22 }
  0x9e   :  { %499 = vmatpush2.msra.mxu0 %v404_v23  ;;  %v516_v23 = vrot.slane %v912_v1, %v515_v19 }
  0x9f   :  { %500 = vmatprep.subr.mxu0 %v403_v24 }
  0xa0   :  { %501 = vmatpush2.msra.mxu0 %v402_v25 }
  0xa1   :  { %502 = vmatprep.subr.mxu0 %v401_v26 }
  0xa2   :  { %503 = vmatpush2.msra.mxu0 %v400_v27  ;;  %v520_v27 = vrot.slane %v914_v2, %v515_v19 }
 0x113   :  { %v194_v5 = vpop.f32.mrf.mxu0 }
 0x114   :  { %v195_v7 = vadd.f32 %v194_v5, %v119_v3  ;;  %v530_v5 = vld [vmem:[#allocation9 + $0x28] sm:$0xff] }
 0x115   :  { %v196_v8 = vpop.f32.mrf.mxu0 }
 0x116   :  { %v197_v9 = vadd.f32 %v196_v8, %v123_v4  ;;  %v199_v11 = vmax.f32 %v195_v7, 0.0  ;;  %v546_v4 = vld [vmem:[#allocation9 + $0xa8] sm:$0xff]  ;;  %v545_v7 = vld [vmem:[#allocation9 + $0xa0] sm:$0xff] }
 0x117   :  { %v529_v8 = vld [vmem:[#allocation9 + $0x20] sm:$0xff] }
 0x118   :  { %v200_v13 = vmax.f32 %v197_v9, 0.0  ;;  %v929_v15 = vadd.f32 %v204_v12, %v199_v11  ;;  %v544_v9 = vld [vmem:[#allocation9 + $0x98] sm:$0xff]  ;;  %v543_v11 = vld [vmem:[#allocation9 + $0x90] sm:$0xff] }
 0x119   :  { %v527_v12 = vld [vmem:[#allocation9 + $0x10] sm:$0xff] }
 0x11a   :  { %v927_v14 = vadd.f32 %v208_v10, %v200_v13  ;;  %v528_v10 = vld [vmem:[#allocation9 + $0x18] sm:$0xff]  ;;  %v542_v13 = vld [vmem:[#allocation9 + $0x88] sm:$0xff] }
 0x11c   :  { %347 = vmatprep.mubr.f32.mxu1 %v927_v14 }
 0x11d   :  { %348 = vmatmul.mubr.f32.vlgmr.msra.gmra.mxu1 %v929_v15 }
 0x11e   :  { %656 = vmatpush3.msra.mxu1 %v540_v29 }
 0x11f   :  { %657 = vmatprep.subr.mxu1 %v555_v30 }
 0x120   :  { %658 = vmatpush3.msra.mxu1 %v539_v31 }
 0x121   :  { %659 = vmatprep.subr.mxu1 %v554_v32 }
 0x122   :  { %660 = vmatpush3.msra.mxu1 %v538_v33 }
 0x123   :  { %661 = vmatprep.subr.mxu1 %v553_v34  ;;  %v560_v34 = vrot.slane %v107_v63, %v910_v0 }
 0x124   :  { %662 = vmatpush3.msra.mxu1 %v537_v35 }
 0x125   :  { %663 = vmatprep.subr.mxu1 %v552_v36 }
 0x126   :  { %664 = vmatpush3.msra.mxu1 %v536_v37  ;;  %v635_v37 = vrot.slane %v107_v63, %v921_v6 }
 0x127   :  { %665 = vmatprep.subr.mxu1 %v551_v38 }
 0x128   :  { %666 = vmatpush3.msra.mxu1 %v535_v39  ;;  %v642_v39 = vrot.slane %v107_v63, %v934_v48 }
 0x129   :  { %667 = vmatprep.subr.mxu1 %v550_v40 }
 0x12a   :  { %668 = vmatpush3.msra.mxu1 %v534_v41 }
 0x12b   :  { %669 = vmatprep.subr.mxu1 %v549_v42 }
 0x12c   :  { %670 = vmatpush3.msra.mxu1 %v533_v43 }
 0x12d   :  { %671 = vmatprep.subr.mxu1 %v548_v44 }
 0x12e   :  { %672 = vmatpush3.msra.mxu1 %v532_v45 }
 0x12f   :  { %673 = vmatprep.subr.mxu1 %v547_v46 }
 0x130   :  { %674 = vmatpush3.msra.mxu1 %v531_v47 }
 0x131   :  { %675 = vmatprep.subr.mxu1 %v546_v4 }
 0x132   :  { %676 = vmatpush3.msra.mxu1 %v530_v5 }
 0x133   :  { %677 = vmatprep.subr.mxu1 %v545_v7 }
 0x134   :  { %678 = vmatpush3.msra.mxu1 %v529_v8 }
 0x135   :  { %679 = vmatprep.subr.mxu1 %v544_v9 }
 0x136   :  { %680 = vmatpush3.msra.mxu1 %v528_v10 }
 0x137   :  { %681 = vmatprep.subr.mxu1 %v543_v11 }
 0x138   :  { %682 = vmatpush3.msra.mxu1 %v527_v12 }
 0x139   :  { %683 = vmatprep.subr.mxu1 %v542_v13 }
 0x1dd   :  { %v349_v52 = vpop.f32.mrf.mxu1 }
 0x1de   :  { %v350_v53 = vadd.f32 %v349_v52, %v278_v49 }
 0x1df   :  { %v351_v55 = vpop.f32.mrf.mxu1 }
 0x1e0   :  { %v354_v56 = vmax.f32 %v350_v53, 0.0  ;;  %v352_v57 = vadd.f32 %v351_v55, %v282_v51 }
 0x1e2   :  { %v355_v59 = vmax.f32 %v352_v57, 0.0  ;;  %v364_v60 = vadd.f32 %v359_v54, %v354_v56 }
 0x1e4   :  { %v365_v61 = vadd.f32 %v363_v58, %v355_v59  ;;  %v366_v3 = vadd.f32 %v364_v60, %v929_v15  ;;  %v541_v15 = vld [vmem:[#allocation9 + $0x80] sm:$0xff] }
 0x1e6   :  { %v367_v62 = vadd.f32 %v365_v61, %v927_v14  ;;  %v526_v14 = vld [vmem:[#allocation9 + $0x8] sm:$0xff] }
 0x1e7   :  { %684 = vmatpush3.msra.mxu1 %v526_v14 }
 0x1e8   :  { %504 = vmatprep.mubr.f32.mxu0 %v367_v62  ;;  %685 = vmatprep.subr.mxu1 %v541_v15 }
 0x1e9   :  { %505 = vmatmul.mubr.f32.vlgmr.msra.gmra.mxu0 %v366_v3  ;;  %686 = vmatpush3.msra.mxu1 %v525_v16 }
 0x2a9   :  { %v506_v21 = vpop.f32.mrf.mxu0 }
 0x2aa   :  { %v507_v22 = vadd.f32 %v506_v21, %v435_v18 }
 0x2ab   :  { %v508_v24 = vpop.f32.mrf.mxu0 }
 0x2ac   :  { %v511_v25 = vmax.f32 %v507_v22, 0.0  ;;  %v509_v26 = vadd.f32 %v508_v24, %v439_v20 }
 0x2ae   :  { %v512_v28 = vmax.f32 %v509_v26, 0.0  ;;  %v521_v29 = vadd.f32 %v516_v23, %v511_v25 }
 0x2b0   :  { %v522_v30 = vadd.f32 %v520_v27, %v512_v28  ;;  %v523_v32 = vadd.f32 %v521_v29, %v366_v3 }
 0x2b2   :  { %v524_v31 = vadd.f32 %v522_v30, %v367_v62 }
 0x2b4   :  { %625 = vmatprep.mubr.f32.mxu1 %v524_v31 }
 0x2b5   :  { %626 = vmatmul.mubr.f32.vlgmr.msra.gmra.mxu1 %v523_v32 }
 0x375   :  { %v687_v33 = vpop.f32.mrf.mxu1 }
 0x377   :  { %v688_v1 = vpop.f32.mrf.mxu1 }
 0x378   :  { %v689_v35 = vadd.f32 %v688_v1, %v687_v33 }
 0x37a   :  { %v628_v36 = vadd.f32 %v689_v35, %v560_v34 }
 0x37c   :  { %v631_v2 = vmax.f32 %v628_v36, 0.0 }
 0x37e   :  { %v636_v38 = vmul.f32 %v635_v37, %v631_v2 }
 0x380   :  { %637 = vadd.xlane.f32.xlu0 %v636_v38 }
 0x409   :  { %v638_v40 = vpop.xlane.xlu0 %637 }
 0x40a   :  { %v643_v41 = vadd.f32 %v642_v39, %v638_v40 }
 0x40c   :  { %645 = vst.msk [vmem:[%s967_s7] sm:$0xff] %vm644_vm1, %v643_v41 }
 0x40d   :  { %650 = vsyncpa [#allocation3], 1 }
 0x40e   :  { %651 = vsyncpa [#allocation5], 1 }
 0x40f   :  { %652 = vsyncpa [#allocation8], 1 }
 0x410   :  { %653 = vsyncpa [#allocation11], 1 }

</bundles_post_ra>
